<compile_context>
chip_gen: v7x
topology: tpu7x:2x2x1
jax: 0.10.0
libtpu: 0.0.40
codegen_flags: <defaults>
</compile_context>

<pallas_src>
import functools

import jax
import jax.numpy as jnp
import numpy as np
from jax.experimental import pallas as pl
from jax.experimental.pallas import tpu as pltpu


# ----------------------------------------------------------------------------
# Static geometric-algebra tables (numpy, computed once at trace time).
# ----------------------------------------------------------------------------
def build_cayley(metric):
    """Cayley tensor cayley[i, j, k] = coefficient of blade k in e_i * e_j,
    with blades ordered by (grade, bitmask) (tfga/torchga ordering), and the
    per-blade reversion signs (-1)^(r(r-1)/2)."""
    metric = np.asarray(metric, dtype=np.float64)
    n = len(metric)
    nb = 1 << n
    bitmasks = sorted(range(nb), key=lambda b: (bin(b).count("1"), b))
    idx_of = {bm: i for i, bm in enumerate(bitmasks)}

    cayley = np.zeros((nb, nb, nb), dtype=np.float32)
    for a_bm in range(nb):
        for b_bm in range(nb):
            # sign from reordering basis vectors into canonical order
            swaps, a_shift = 0, a_bm >> 1
            while a_shift:
                swaps += bin(a_shift & b_bm).count("1")
                a_shift >>= 1
            sign = -1.0 if (swaps & 1) else 1.0
            # metric contraction of repeated basis vectors
            common = a_bm & b_bm
            for i in range(n):
                if common & (1 << i):
                    sign *= metric[i]
            cayley[idx_of[a_bm], idx_of[b_bm], idx_of[a_bm ^ b_bm]] = sign

    grades = np.array([bin(bm).count("1") for bm in bitmasks])
    rev_signs = np.where((grades * (grades - 1) // 2) % 2 == 0, 1.0, -1.0)
    return cayley, rev_signs.astype(np.float32)


# ----------------------------------------------------------------------------
# Small helpers.
# ----------------------------------------------------------------------------
def _round_up(x: int, m: int) -> int:
    return ((x + m - 1) // m) * m


def _cdiv(a: int, b: int) -> int:
    return -(-a // b)


def _apply_activation(x, activation: str):
    if activation == "relu":
        return jnp.maximum(x, 0.0)
    if activation == "sigmoid":
        return jax.nn.sigmoid(x)
    if activation == "tanh":
        return jnp.tanh(x)
    return x  # module's else branch -> identity


def _choose_row_tile(m_pad: int, sub: int, tm_want: int, tm_cap: int):
    """Pick a row-tile size (multiple of `sub`) and grid step count.

    Prefers >= 4 grid steps (pipeline steady state on 1-TC chips) when the row
    count permits without shrinking tiles below ~512 rows, keeps a >= 2-step
    floor where possible, and rounds the step count to even so a purely
    parallel grid splits evenly across v7x's two TensorCores."""
    tm = min(tm_want, tm_cap, m_pad)
    tm = max(sub, (tm // sub) * sub)
    steps = _cdiv(m_pad, tm)

    min_rows = max(sub, min(512, tm_want))
    if steps < 4 and m_pad >= 4 * min_rows:
        steps = 4
    elif steps < 2 and m_pad >= 2 * min_rows:
        steps = 2

    for _ in range(4):
        if steps > 1 and steps % 2 == 1:
            steps += 1
        tm = _round_up(_cdiv(m_pad, steps), sub)
        tm = max(sub, min(tm, tm_cap))
        new_steps = _cdiv(m_pad, tm)
        if new_steps == steps:
            break
        steps = new_steps
    return tm, steps


# ----------------------------------------------------------------------------
# Pallas kernel: fused (block-diag sandwich matmul) + bias + activation.
# ----------------------------------------------------------------------------
def _sandwich_kernel(x_ref, w_ref, b_ref, o_ref, *, activation, precision):
    # x_ref: (tm, F_pad) flattened activations (input dtype)
    # w_ref: (F_pad, F_pad) block-diagonal sandwich operator, f32, resident
    # b_ref: (1, F_pad)   bias multivectors, f32, resident
    # o_ref: (tm, F_pad)
    acc = jnp.dot(x_ref[...], w_ref[...],
                  preferred_element_type=jnp.float32, precision=precision)
    acc = acc + b_ref[...]
    acc = _apply_activation(acc, activation)
    o_ref[...] = acc.astype(o_ref.dtype)


def geometric_sandwich_product_elementwise(
    inputs: jax.Array,
    kernel: jax.Array,
    bias,
    blade_indices_kernel,
    blade_indices_bias,
    metric,
    *,
    activation: str = "relu",
    tm: int = 1024,
    precision=jax.lax.Precision.HIGHEST,
    min_pallas_bytes: int = 1 << 20,
    max_dense_operator_bytes: int = 16 << 20,
) -> jax.Array:
    """Pallas equivalent of GeometricSandwichProductElementwise.forward.

    inputs: [..., num_input_units, num_blades]
    kernel: [num_input_units, len(blade_indices_kernel)]
    bias:   [num_input_units, len(blade_indices_bias)] or None
    """
    cayley_np, rev_np = build_cayley(metric)
    B = cayley_np.shape[0]
    U = kernel.shape[0]
    assert inputs.shape[-1] == B and inputs.shape[-2] == U, (inputs.shape, U, B)

    cayley = jnp.asarray(cayley_np)
    rev = jnp.asarray(rev_np)
    bi_k = jnp.asarray(np.asarray(blade_indices_kernel, dtype=np.int32))

    dtype = inputs.dtype
    itemsize = jnp.dtype(dtype).itemsize
    F = U * B
    F_pad = max(128, _round_up(F, 128))

    # from_tensor: scatter kernel coefficients into full multivectors (U, B)
    w = jnp.zeros((U, B), jnp.float32).at[:, bi_k].set(kernel.astype(jnp.float32))
    w_rev = w * rev[None, :]
    # Right-mult by ~w and left-mult by w as per-unit (B, B) matrices, fused:
    #   y   = x @ R_u, R_u[i, k] = sum_j cayley[i, j, k] * (~w_u)[j]
    #   out = y @ L_u, L_u[k, m] = sum_l cayley[l, k, m] *   w_u [l]
    R = jnp.einsum("ijk,uj->uik", cayley, w_rev)
    L = jnp.einsum("lkm,ul->ukm", cayley, w)
    S = jnp.einsum("uik,ukm->uim", R, L)  # (U, B, B) per-unit sandwich matrix

    if bias is not None:
        bi_b = jnp.asarray(np.asarray(blade_indices_bias, dtype=np.int32))
        b_geom = jnp.zeros((U, B), jnp.float32).at[:, bi_b].set(
            bias.astype(jnp.float32))
    else:
        b_geom = jnp.zeros((U, B), jnp.float32)

    lead = inputs.shape[:-2]
    M = int(np.prod(lead)) if lead else 1

    # Sub-32-bit dtypes pack more rows per vreg: round rows accordingly.
    sub = max(8, 32 // itemsize)  # f32: 8, bf16: 16, int8/fp8: 32
    M_pad = _round_up(M, sub)

    operator_bytes = F_pad * F_pad * 4
    stream_bytes_est = M_pad * F_pad * itemsize

    if stream_bytes_est < min_pallas_bytes or operator_bytes > max_dense_operator_bytes:
        # Tiny streams: per-step + launch overhead dominates, XLA fusion is at
        # roofline already.  Huge F: the dense F^2 operator no longer fits VMEM.
        # TODO(synk): banded pltpu.roll / per-unit (B,B) kernel path for very
        # large U*B instead of falling back to XLA.
        y = jnp.einsum("...uj,ujk->...uk", inputs.astype(jnp.float32), S,
                       precision=precision)
        y = _apply_activation(y + b_geom, activation)
        return y.astype(dtype)

    # Block-diagonal operator (F_pad, F_pad), kept in f32 (accumulation is f32
    # anyway; avoids losing operator precision for bf16 activations).
    Wbd = jnp.einsum("ujk,uv->ujvk", S, jnp.eye(U, dtype=jnp.float32))
    Wbd = Wbd.reshape(F, F)
    if F_pad != F:
        Wbd = jnp.zeros((F_pad, F_pad), jnp.float32).at[:F, :F].set(Wbd)
    b_row = b_geom.reshape(1, F)
    if F_pad != F:
        b_row = jnp.zeros((1, F_pad), jnp.float32).at[:, :F].set(b_row)

    x2 = inputs.reshape(M, F)
    if M_pad != M or F_pad != F:
        x2 = jnp.pad(x2, ((0, M_pad - M), (0, F_pad - F)))

    # Row-tile selection: cap so double-buffered x/out tiles stay within a
    # conservative stream budget (fits v5e's 16 MiB scoped default alongside
    # the single-buffered operator), then aim for >= 4 even grid steps.
    stream_budget = 12 << 20
    bytes_per_row = F_pad * itemsize * 4  # x + out, each double-buffered
    tm_cap = max(sub, ((stream_budget // bytes_per_row) // sub) * sub)
    tm_eff, steps = _choose_row_tile(M_pad, sub, int(tm), tm_cap)

    vmem_need = (tm_eff * F_pad * itemsize * 4   # x + out, double-buffered
                 + operator_bytes                # single-buffered operator
                 + F_pad * 4)                    # single-buffered bias row
    vmem_limit = int(min(64 << 20, max(vmem_need + (4 << 20), 16 << 20)))

    out2 = pl.pallas_call(
        functools.partial(_sandwich_kernel, activation=activation,
                          precision=precision),
        out_shape=jax.ShapeDtypeStruct((M_pad, F_pad), dtype),
        grid_spec=pltpu.PrefetchScalarGridSpec(
            num_scalar_prefetch=0,
            grid=(steps,),
            in_specs=[
                pl.BlockSpec((tm_eff, F_pad), lambda i: (i, 0)),
                # Constant operands: single-buffer them (no dead 2nd buffer).
                pl.BlockSpec((F_pad, F_pad), lambda i: (0, 0),
                             pipeline_mode=pl.Buffered(1)),
                pl.BlockSpec((1, F_pad), lambda i: (0, 0),
                             pipeline_mode=pl.Buffered(1)),
            ],
            out_specs=pl.BlockSpec((tm_eff, F_pad), lambda i: (i, 0)),
        ),
        compiler_params=pltpu.CompilerParams(
            dimension_semantics=("parallel",),
            vmem_limit_bytes=vmem_limit,
        ),
    )(x2, Wbd, b_row)

    if M_pad != M or F_pad != F:
        out2 = out2[:M, :F]
    return out2.reshape(*lead, U, B)


if __name__ == "__main__":
    # GA(4), Euclidean metric -> 2^4 = 16 blades; 8 input units -> U*B = 128.
    metric = [1.0, 1.0, 1.0, 1.0]
    num_blades = 2 ** len(metric)
    num_units = 8
    batch, seq = 2, 8

    # Rotor-style parameterization: scalar + the 6 bivector blades.
    blade_indices_kernel = [0, 5, 6, 7, 8, 9, 10]
    # Module aliases blade_indices_bias to blade_indices_kernel in __init__.
    blade_indices_bias = blade_indices_kernel

    # Small integer-valued test data (cast to f32) so the check is exact under
    # any MXU precision mode, while exercising the full sandwich/bias/relu path.
    key = jax.random.PRNGKey(0)
    kx, kk, kb = jax.random.split(key, 3)
    x = jax.random.randint(kx, (batch, seq, num_units, num_blades), -3, 4
                           ).astype(jnp.float32)
    kernel = jax.random.randint(kk, (num_units, len(blade_indices_kernel)), -1, 2
                                ).astype(jnp.float32)
    bias = jax.random.randint(kb, (num_units, len(blade_indices_bias)), -2, 3
                              ).astype(jnp.float32)

    # Force the Pallas path at this small demo size (production default falls
    # back to XLA below ~1 MiB of streamed activations).
    out = geometric_sandwich_product_elementwise(
        x, kernel, bias, blade_indices_kernel, blade_indices_bias, metric,
        activation="relu", min_pallas_bytes=0)
    out = jax.block_until_ready(out)

    # Also exercise the small-M XLA fallback path (default thresholds).
    out_fallback = geometric_sandwich_product_elementwise(
        x, kernel, bias, blade_indices_kernel, blade_indices_bias, metric,
        activation="relu")
    out_fallback = jax.block_until_ready(out_fallback)

    # Pure-JAX reference with explicit Cayley contractions (module semantics):
    #   relu( geom_prod(w, geom_prod(x, reversion(w))) + b_geom )
    cayley_np, rev_np = build_cayley(metric)
    cayley = jnp.asarray(cayley_np)
    rev = jnp.asarray(rev_np)
    bi_k = jnp.asarray(blade_indices_kernel, dtype=jnp.int32)
    bi_b = jnp.asarray(blade_indices_bias, dtype=jnp.int32)
    w = jnp.zeros((num_units, num_blades), jnp.float32).at[:, bi_k].set(kernel)
    w_rev = w * rev[None, :]
    y = jnp.einsum("...ui,ijk,uj->...uk", x, cayley, w_rev)   # geom_prod(x, ~w)
    ref = jnp.einsum("ul,lkm,...uk->...um", w, cayley, y)     # geom_prod(w, .)
    b_geom = jnp.zeros((num_units, num_blades), jnp.float32).at[:, bi_b].set(bias)
    ref = jnp.maximum(ref + b_geom, 0.0)

    assert out.shape == ref.shape, (out.shape, ref.shape)
    assert out.dtype == x.dtype
    np.testing.assert_allclose(np.asarray(out), np.asarray(ref),
                               rtol=0.0, atol=1e-5)
    np.testing.assert_allclose(np.asarray(out_fallback), np.asarray(ref),
                               rtol=0.0, atol=1e-5)
    print("KERNEL_OK")
</pallas_src>

<mosaic_0001>
module attributes {stable_mosaic.version = 11 : i64} {
  func.func @_sandwich_kernel(%arg0: i32, %arg1: memref<16x128xf32, #tpu.memory_space<vmem>>, %arg2: memref<128x128xf32, #tpu.memory_space<vmem>>, %arg3: memref<1x128xf32, #tpu.memory_space<vmem>>, %arg4: memref<16x128xf32, #tpu.memory_space<vmem>>) attributes {dimension_semantics = [#tpu.dimension_semantics<parallel>], iteration_bounds = array<i64: 1>, scalar_prefetch = 0 : i64, scratch_operands = 0 : i64, tpu.core_type = #tpu.core_type<tc>, window_params = [{transform_indices = @transform_0, window_bounds = array<i64: 16, 128>}, {pipeline_mode = #tpu.pipeline_mode<synchronous>, transform_indices = @transform_1, window_bounds = array<i64: 128, 128>}, {pipeline_mode = #tpu.pipeline_mode<synchronous>, transform_indices = @transform_2, window_bounds = array<i64: 1, 128>}, {transform_indices = @transform_3, window_bounds = array<i64: 16, 128>}]} {
    %c0 = arith.constant 0 : index
    %c0_0 = arith.constant 0 : index
    %0 = vector.load %arg1[%c0, %c0_0] : memref<16x128xf32, #tpu.memory_space<vmem>>, vector<16x128xf32>
    %c0_1 = arith.constant 0 : index
    %c0_2 = arith.constant 0 : index
    %1 = vector.load %arg2[%c0_1, %c0_2] : memref<128x128xf32, #tpu.memory_space<vmem>>, vector<128x128xf32>
    %cst = arith.constant dense<0.000000e+00> : vector<16x128xf32>
    %2 = tpu.matmul %0, %1, %cst {dimension_numbers = #tpu.dot_dimension_numbers<[1], [0], [0], [1], [0, 0, 1, 1], [], []>, precision = #tpu.contract_precision<fp32>} : vector<16x128xf32>, vector<128x128xf32>, vector<16x128xf32> -> vector<16x128xf32>
    %c0_3 = arith.constant 0 : index
    %c0_4 = arith.constant 0 : index
    %3 = vector.load %arg3[%c0_3, %c0_4] : memref<1x128xf32, #tpu.memory_space<vmem>>, vector<1x128xf32>
    %4 = vector.broadcast %3 : vector<1x128xf32> to vector<16x128xf32>
    %5 = arith.addf %2, %4 : vector<16x128xf32>
    %cst_5 = arith.constant 0.000000e+00 : f32
    %6 = vector.broadcast %cst_5 : f32 to vector<16x128xf32>
    %7 = arith.maximumf %5, %6 : vector<16x128xf32>
    %c0_6 = arith.constant 0 : index
    %c0_7 = arith.constant 0 : index
    %8 = vector.load %arg4[%c0_6, %c0_7] : memref<16x128xf32, #tpu.memory_space<vmem>>, vector<16x128xf32>
    tpu.vector_store %arg4[%c0_6, %c0_7], %7 {strides = array<i32>} : memref<16x128xf32, #tpu.memory_space<vmem>>, vector<16x128xf32>,
    return
  }
  func.func @transform_0(%arg0: i32) -> (i32, i32) {
    %c0_i32 = arith.constant 0 : i32
    %c0_i32_0 = arith.constant 0 : i32
    return %arg0, %c0_i32 : i32, i32
  }
  func.func @transform_1(%arg0: i32) -> (i32, i32) {
    %c0_i32 = arith.constant 0 : i32
    %c0_i32_0 = arith.constant 0 : i32
    %c0_i32_1 = arith.constant 0 : i32
    return %c0_i32, %c0_i32_0 : i32, i32
  }
  func.func @transform_2(%arg0: i32) -> (i32, i32) {
    %c0_i32 = arith.constant 0 : i32
    %c0_i32_0 = arith.constant 0 : i32
    %c0_i32_1 = arith.constant 0 : i32
    return %c0_i32, %c0_i32_0 : i32, i32
  }
  func.func @transform_3(%arg0: i32) -> (i32, i32) {
    %c0_i32 = arith.constant 0 : i32
    %c0_i32_0 = arith.constant 0 : i32
    return %arg0, %c0_i32 : i32, i32
  }
}

</mosaic_0001>

<bundles_post_ra>
// kernel: tpu_custom_call.1
= control target key start
LH: loop header
LB: loop body
LE: loop exit
PB: predicated region body
PF: predicated region fallthrough
CT: control target
= control target key end

     0   :  { %8 = vsyncpa [#allocation3], 0  ;;  %s1713_s0 = inlined_call_operand.hbm [shape: f32[16,128], index: 0, kind: input, shape index: {}]   ;;  %s1714_s1 = inlined_call_operand.hbm [shape: f32[128,128], index: 1, kind: input, shape index: {}]   ;;  %s1715_s2 = inlined_call_operand.vmem [shape: f32[1,128], index: 2, kind: input, shape index: {}]   ;;  %s1716_s3 = inlined_call_operand.hbm [shape: f32[16,128], index: 3, kind: output, shape index: {}]  }
   0x1   :  { %9 = vsyncpa [#allocation6], 0 }
   0x2   :  { %10 = vsyncpa [#allocation4], 0  ;;  %s1374_s12 = smov [#allocation2]   ;;  %s1302_s16 = scalar_lea.hbm %s1713_s0, 256 }
   0x3   :  { %s16_s13 = sshll.u32 %s1374_s12, 4  ;;  %p1303_p0 = scmp.ne.s32.totalorder %s1713_s0, %s1302_s16  ;;  %s17_s13 = int_to_ptr.vmem [resolvable:$true] %s16_s13 }
   0x4   :  { %p1306_p1 = scmp.lt.u32.totalorder %s1302_s16, %s1713_s0 }
   0x6   :  { %p1308_p2 = pnand %p1306_p1, %p1303_p0 }
   0x8   :  { %1311 = shalt.err (!%p1308_p2)
}
   0x9   :  { %s1312_s21 = scalar_lea.vmem %s17_s13, 256  ;;  %p1317_p4 = scmp.lt.s32.totalorder %s17_s13, %s17_s13 }
   0xa   :  { %p1313_p3 = scmp.ne.s32.totalorder %s17_s13, %s1312_s21  ;;  %p1318_p5 = scmp.lt.s32.totalorder %s1312_s21, %s1312_s21 }
   0xc   :  { %p1319_p6 = por %p1318_p5, %p1317_p4 }
   0xe   :  { %p1320_p7 = pnand %p1319_p6, %p1313_p3 }
  0x10   :  { %1323 = shalt.err (!%p1320_p7)
}
  0x11   :  { %s1375_s22 = smov 128   ;;  %s1376_s23 = smov 8  }
  0x12   :  { %22 = dma.hbm_to_vmem [thread:$0]  %s1713_s0, 256, %s17_s13, [#allocation3], %s1375_s22, %s1375_s22, %s1376_s23  }
  0x13   :  { %s1377_s26 = smov [#allocation5]   ;;  %s1324_s30 = scalar_lea.hbm %s1714_s1, 2048 }
  0x14   :  { %s28_s27 = sshll.u32 %s1377_s26, 4  ;;  %p1325_p8 = scmp.ne.s32.totalorder %s1714_s1, %s1324_s30  ;;  %s29_s27 = int_to_ptr.vmem [resolvable:$true] %s28_s27 }
  0x15   :  { %p1328_p9 = scmp.lt.u32.totalorder %s1324_s30, %s1714_s1 }
  0x17   :  { %p1330_p10 = pnand %p1328_p9, %p1325_p8 }
  0x19   :  { %1333 = shalt.err (!%p1330_p10)
}
  0x1a   :  { %s1334_s8 = scalar_lea.vmem %s29_s27, 2048  ;;  %p1339_p12 = scmp.lt.s32.totalorder %s29_s27, %s29_s27 }
  0x1b   :  { %p1335_p11 = scmp.ne.s32.totalorder %s29_s27, %s1334_s8  ;;  %p1340_p13 = scmp.lt.s32.totalorder %s1334_s8, %s1334_s8 }
  0x1d   :  { %p1341_p0 = por %p1340_p13, %p1339_p12 }
  0x1f   :  { %p1342_p1 = pnand %p1341_p0, %p1335_p11 }
  0x21   :  { %1345 = shalt.err (!%p1342_p1)
}
  0x22   :  { %34 = dma.hbm_to_vmem [thread:$0]  %s1714_s1, 2048, %s29_s27, [#allocation6], %s1375_s22, %s1375_s22, %s1376_s23  }
  0x23   :  { %1368 = dma.done.wait [#allocation3], 256  }
  0x24   :  { %1369 = vsyncadd [#allocation3], 4294967040 }
  0x25   :  { %1370 = dma.done.wait [#allocation6], 2048  }
  0x26   :  { %1371 = vsyncadd [#allocation6], 4294965248  ;;  %v45_v0 = vld [vmem:[#allocation5] sm:$0xff]  ;;  %v46_v1 = vld [vmem:[#allocation5 + $0x8] sm:$0xff]  ;;  %s1378_s11 = smov [#allocation7]  }
  0x27   :  { %v47_v2 = vld [vmem:[#allocation5 + $0x10] sm:$0xff]  ;;  %v69_v3 = vand.u32 4294901760, %v45_v0  ;;  %v72_v4 = vand.u32 4294901760, %v46_v1  ;;  %v1429_v5 = vld [vmem:[#allocation5 + $0x18] sm:$0xff]  ;;  %v1431_v7 = vld [vmem:[#allocation5 + $0x20] sm:$0xff]  ;;  %s761_s12 = sshll.u32 %s1378_s11, 4  ;;  %s762_s12 = int_to_ptr.vmem [resolvable:$true] %s761_s12 }
  0x28   :  { %v75_v6 = vand.u32 4294901760, %v47_v2  ;;  %v1433_v8 = vld [vmem:[#allocation5 + $0x28] sm:$0xff]  ;;  %v78_v9 = vand.u32 4294901760, %v1429_v5  ;;  %v81_v11 = vand.u32 4294901760, %v1431_v7  ;;  %v1442_v14 = vld [vmem:[#allocation5 + $0x30] sm:$0xff]  ;;  %v1444_v15 = vld [vmem:[#allocation5 + $0x38] sm:$0xff]  ;;  %p1351_p3 = scmp.lt.s32.totalorder %s762_s12, %s762_s12 }
  0x29   :  { %v1436_v10 = vpack.c.bf16 %v72_v4, %v69_v3  ;;  %v84_v12 = vand.u32 4294901760, %v1433_v8  ;;  %v43_v16 = vld [vmem:[#allocation2] sm:$0xff]  ;;  %v87_v19 = vand.u32 4294901760, %v1442_v14  ;;  %v90_v20 = vand.u32 4294901760, %v1444_v15  ;;  %v1462_v21 = vld [vmem:[#allocation5 + $0x40] sm:$0xff]  ;;  %v1464_v22 = vld [vmem:[#allocation5 + $0x48] sm:$0xff] }
  0x2a   :  { %v1440_v13 = vpack.c.bf16 %v78_v9, %v75_v6  ;;  %v1450_v17 = vand.u32 4294901760, %v43_v16  ;;  %v93_v26 = vand.u32 4294901760, %v1462_v21  ;;  %v96_v27 = vand.u32 4294901760, %v1464_v22  ;;  %v1482_v28 = vld [vmem:[#allocation5 + $0x50] sm:$0xff]  ;;  %v1484_v29 = vld [vmem:[#allocation5 + $0x58] sm:$0xff]  ;;  %v1499_v36 = vld [vmem:[#allocation5 + $0x60] sm:$0xff] }
  0x2b   :  { %1094 = vmatprep.subr.bf16.mxu1 %v1436_v10  ;;  %1190 = vmatprep.subr.bf16.mxu0 %v1436_v10  ;;  %v1458_v18 = vpack.c.bf16 %v84_v12, %v81_v11  ;;  %v1478_v25 = vpack.c.bf16 %v90_v20, %v87_v19  ;;  %v99_v31 = vand.u32 4294901760, %v1482_v28  ;;  %v44_v33 = vld [vmem:[#allocation2 + $0x8] sm:$0xff]  ;;  %v102_v35 = vand.u32 4294901760, %v1484_v29  ;;  %v1501_v37 = vld [vmem:[#allocation5 + $0x68] sm:$0xff]  ;;  %v1513_v43 = vld [vmem:[#allocation5 + $0x70] sm:$0xff]  ;;  %s1346_s13 = scalar_lea.vmem %s762_s12, 256 }
  0x2c   :  { %1096 = vmatpush3.bf16.msra.mxu1 %v1436_v10  ;;  %1192 = vmatpush3.bf16.msra.mxu0 %v1436_v10  ;;  %v1467_v23 = vsub.f32 %v43_v16, %v1450_v17  ;;  %v1496_v34 = vpack.c.bf16 %v96_v27, %v93_v26  ;;  %v1503_v38 = vsub.f32 %v45_v0, %v69_v3  ;;  %v1507_v40 = vand.u32 4294901760, %v44_v33  ;;  %v1515_v44 = vld [vmem:[#allocation5 + $0x78] sm:$0xff]  ;;  %p1347_p2 = scmp.ne.s32.totalorder %s762_s12, %s1346_s13  ;;  %p1352_p4 = scmp.lt.s32.totalorder %s1346_s13, %s1346_s13 }
  0x2d   :  { %1098 = vmatprep.subr.bf16.mxu1 %v1440_v13  ;;  %1194 = vmatprep.subr.bf16.mxu0 %v1440_v13  ;;  %v1505_v39 = vsub.f32 %v46_v1, %v72_v4  ;;  %v105_v41 = vand.u32 4294901760, %v1499_v36  ;;  %v108_v42 = vand.u32 4294901760, %v1501_v37  ;;  %v1517_v45 = vsub.f32 %v47_v2, %v75_v6 }
  0x2e   :  { %v151_v24 = vand.u32 4294901760, %v1467_v23  ;;  %v1525_v46 = vpack.c.bf16 %v102_v35, %v99_v31  ;;  %v172_v47 = vand.u32 4294901760, %v1503_v38  ;;  %v1530_v49 = vsub.f32 %v1429_v5, %v78_v9  ;;  %p1353_p5 = por %p1352_p4, %p1351_p3 }
  0x2f   :  { %v179_v48 = vand.u32 4294901760, %v1505_v39  ;;  %v111_v50 = vand.u32 4294901760, %v1513_v43  ;;  %v114_v51 = vand.u32 4294901760, %v1515_v44  ;;  %v1535_v52 = vsub.f32 %v44_v33, %v1507_v40 }
  0x30   :  { %1100 = vmatpush3.bf16.msra.mxu1 %v1440_v13  ;;  %1196 = vmatpush3.bf16.msra.mxu0 %v1440_v13  ;;  %v152_v30 = vsub.f32 %v1467_v23, %v151_v24  ;;  %v1543_v53 = vpack.c.bf16 %v108_v42, %v105_v41  ;;  %v186_v54 = vand.u32 4294901760, %v1517_v45  ;;  %v1549_v55 = vsub.f32 %v1431_v7, %v81_v11  ;;  %p1354_p6 = pnand %p1353_p5, %p1347_p2 }
  0x31   :  { %1102 = vmatprep.subr.bf16.mxu1 %v1458_v18  ;;  %1198 = vmatprep.subr.bf16.mxu0 %v1458_v18  ;;  %v173_v56 = vsub.f32 %v1503_v38, %v172_v47  ;;  %v180_v57 = vsub.f32 %v1505_v39, %v179_v48  ;;  %v193_v58 = vand.u32 4294901760, %v1530_v49  ;;  %v1559_v59 = vsub.f32 %v1433_v8, %v84_v12 }
  0x32   :  { %1020 = vmatprep.mubr.f32.mxu0 %v151_v24  ;;  %v153_v32 = vand.u32 4294901760, %v152_v30  ;;  %v1565_v60 = vpack.c.bf16 %v114_v51, %v111_v50  ;;  %v161_v61 = vand.u32 4294901760, %v1535_v52  ;;  %v187_v62 = vsub.f32 %v1517_v45, %v186_v54 }
  0x33   :  { %v200_v63 = vand.u32 4294901760, %v1549_v55  ;;  %v1575_v0 = vsub.f32 %v1442_v14, %v87_v19  ;;  %v1580_v1 = vsub.f32 %v1444_v15, %v90_v20  ;;  %v174_v2 = vand.u32 4294901760, %v173_v56 }
  0x34   :  { %1104 = vmatpush3.bf16.msra.mxu1 %v1458_v18  ;;  %1200 = vmatpush3.bf16.msra.mxu0 %v1458_v18  ;;  %v181_v3 = vand.u32 4294901760, %v180_v57  ;;  %v194_v4 = vsub.f32 %v1530_v49, %v193_v58  ;;  %v207_v5 = vand.u32 4294901760, %v1559_v59  ;;  %v1221_v6 = vpack.c.bf16 %v179_v48, %v172_v47 }
  0x35   :  { %1106 = vmatprep.subr.bf16.mxu1 %v1478_v25  ;;  %1202 = vmatprep.subr.bf16.mxu0 %v1478_v25  ;;  %v162_v7 = vsub.f32 %v1535_v52, %v161_v61  ;;  %v1590_v8 = vsub.f32 %v1462_v21, %v93_v26  ;;  %v188_v9 = vand.u32 4294901760, %v187_v62  ;;  %v201_v11 = vsub.f32 %v1549_v55, %v200_v63 }
  0x36   :  { %915 = vmatprep.mubr.f32.mxu1 %v153_v32  ;;  %v214_v12 = vand.u32 4294901760, %v1575_v0  ;;  %v221_v14 = vand.u32 4294901760, %v1580_v1  ;;  %v1125_v15 = vpack.c.bf16 %v181_v3, %v174_v2  ;;  %v195_v16 = vand.u32 4294901760, %v194_v4 }
  0x37   :  { %v208_v19 = vsub.f32 %v1559_v59, %v207_v5  ;;  %v1603_v20 = vsub.f32 %v1464_v22, %v96_v27  ;;  %v163_v21 = vand.u32 4294901760, %v162_v7  ;;  %v1225_v24 = vpack.c.bf16 %v193_v58, %v186_v54 }
  0x38   :  { %1108 = vmatpush3.bf16.msra.mxu1 %v1478_v25  ;;  %1204 = vmatpush3.bf16.msra.mxu0 %v1478_v25  ;;  %v228_v26 = vand.u32 4294901760, %v1590_v8  ;;  %v1609_v30 = vsub.f32 %v1482_v28, %v99_v31  ;;  %v215_v32 = vsub.f32 %v1575_v0, %v214_v12  ;;  %v222_v33 = vsub.f32 %v1580_v1, %v221_v14 }
  0x39   :  { %1110 = vmatprep.subr.bf16.mxu1 %v1496_v34  ;;  %1206 = vmatprep.subr.bf16.mxu0 %v1496_v34  ;;  %v1618_v22 = vsub.f32 %v1484_v29, %v102_v35  ;;  %v1129_v27 = vpack.c.bf16 %v195_v16, %v188_v9  ;;  %v202_v47 = vand.u32 4294901760, %v201_v11  ;;  %v209_v48 = vand.u32 4294901760, %v208_v19 }
  0x3a   :  { %v235_v28 = vand.u32 4294901760, %v1603_v20  ;;  %v1229_v31 = vpack.c.bf16 %v207_v5, %v200_v63  ;;  %v229_v54 = vsub.f32 %v1590_v8, %v228_v26  ;;  %v1625_v56 = vsub.f32 %v1499_v36, %v105_v41 }
  0x3b   :  { %v216_v29 = vand.u32 4294901760, %v215_v32  ;;  %v223_v35 = vand.u32 4294901760, %v222_v33  ;;  %v242_v57 = vand.u32 4294901760, %v1609_v30  ;;  %v249_v58 = vand.u32 4294901760, %v1618_v22 }
  0x3c   :  { %1112 = vmatpush3.bf16.msra.mxu1 %v1496_v34  ;;  %1208 = vmatpush3.bf16.msra.mxu0 %v1496_v34  ;;  %v1133_v62 = vpack.c.bf16 %v209_v48, %v202_v47  ;;  %v1633_v63 = vsub.f32 %v1501_v37, %v108_v42  ;;  %v1233_v36 = vpack.c.bf16 %v221_v14, %v214_v12  ;;  %v230_v41 = vand.u32 4294901760, %v229_v54 }
  0x3d   :  { %1114 = vmatprep.subr.bf16.mxu1 %v1525_v46  ;;  %1210 = vmatprep.subr.bf16.mxu0 %v1525_v46  ;;  %v1137_v2 = vpack.c.bf16 %v223_v35, %v216_v29  ;;  %v243_v3 = vsub.f32 %v1609_v30, %v242_v57  ;;  %v250_v4 = vsub.f32 %v1618_v22, %v249_v58  ;;  %v256_v5 = vand.u32 4294901760, %v1625_v56 }
  0x3e   :  { %v263_v37 = vand.u32 4294901760, %v1633_v63  ;;  %v1644_v42 = vsub.f32 %v1513_v43, %v111_v50  ;;  %v1649_v7 = vsub.f32 %v1515_v44, %v114_v51  ;;  %v1237_v9 = vpack.c.bf16 %v235_v28, %v228_v26 }
  0x3f   :  { %v244_v11 = vand.u32 4294901760, %v243_v3  ;;  %v251_v12 = vand.u32 4294901760, %v250_v4  ;;  %v257_v14 = vsub.f32 %v1625_v56, %v256_v5  ;;  %v1241_v51 = vpack.c.bf16 %v249_v58, %v242_v57 }
  0x40   :  { %1116 = vmatpush3.bf16.msra.mxu1 %v1525_v46  ;;  %1212 = vmatpush3.bf16.msra.mxu0 %v1525_v46  ;;  %v264_v16 = vsub.f32 %v1633_v63, %v263_v37  ;;  %v270_v43 = vand.u32 4294901760, %v1644_v42  ;;  %v277_v50 = vand.u32 4294901760, %v1649_v7  ;;  %v1245_v33 = vpack.c.bf16 %v263_v37, %v256_v5 }
  0x41   :  { %1118 = vmatprep.subr.bf16.mxu1 %v1543_v53  ;;  %1214 = vmatprep.subr.bf16.mxu0 %v1543_v53  ;;  %v1145_v44 = vpack.c.bf16 %v251_v12, %v244_v11  ;;  %v258_v19 = vand.u32 4294901760, %v257_v14  ;;  %v1161_v54 = vpack.c.bf16 %v1530_v49, %v1517_v45 }
  0x42   :  { %v278_v26 = vsub.f32 %v1649_v7, %v277_v50 }
  0x44   :  { %1120 = vmatpush3.bf16.msra.mxu1 %v1543_v53  ;;  %1216 = vmatpush3.bf16.msra.mxu0 %v1543_v53  ;;  %v279_v47 = vand.u32 4294901760, %v278_v26 }
  0x45   :  { %1122 = vmatprep.subr.bf16.mxu1 %v1565_v60  ;;  %1218 = vmatprep.subr.bf16.mxu0 %v1565_v60 }
  0x48   :  { %1124 = vmatpush3.bf16.msra.mxu1 %v1565_v60  ;;  %1220 = vmatpush3.bf16.msra.mxu0 %v1565_v60 }
  0x49   :  { %1126 = vmatprep.subr.bf16.mxu1 %v1125_v15  ;;  %1222 = vmatprep.subr.bf16.mxu0 %v1221_v6 }
  0x4b   :  { %916 = vmatmul.mubr.f32.vlgmr.msra.gmra.mrb[0].mxu1 %v163_v21  ;;  %1021 = vmatmul.mubr.f32.vlgmr.msra.gmra.mrb[0].mxu0 %v161_v61  ;;  %v236_v61 = vsub.f32 %v1603_v20, %v235_v28  ;;  %v265_v21 = vand.u32 4294901760, %v264_v16  ;;  %v1249_v28 = vpack.c.bf16 %v277_v50, %v270_v43 }
  0x4c   :  { %1128 = vmatpush3.bf16.msra.mxu1 %v1125_v15  ;;  %1224 = vmatpush3.bf16.msra.mxu0 %v1221_v6 }
  0x4d   :  { %1130 = vmatprep.subr.bf16.mxu1 %v1129_v27  ;;  %1226 = vmatprep.subr.bf16.mxu0 %v1225_v24  ;;  %v237_v6 = vand.u32 4294901760, %v236_v61  ;;  %v1149_v32 = vpack.c.bf16 %v265_v21, %v258_v19 }
  0x4e   :  { %950 = vmatprep.mubr.f32.mxu1 %v1450_v17  ;;  %1055 = vmatprep.mubr.f32.mxu0 %v1450_v17 }
  0x4f   :  { %v1141_v15 = vpack.c.bf16 %v237_v6, %v230_v41 }
  0x50   :  { %1132 = vmatpush3.bf16.msra.mxu1 %v1129_v27  ;;  %1228 = vmatpush3.bf16.msra.mxu0 %v1225_v24  ;;  %v271_v24 = vsub.f32 %v1644_v42, %v270_v43 }
  0x51   :  { %1134 = vmatprep.subr.bf16.mxu1 %v1133_v62  ;;  %1230 = vmatprep.subr.bf16.mxu0 %v1229_v31 }
  0x52   :  { %v272_v27 = vand.u32 4294901760, %v271_v24 }
  0x54   :  { %1136 = vmatpush3.bf16.msra.mxu1 %v1133_v62  ;;  %1232 = vmatpush3.bf16.msra.mxu0 %v1229_v31  ;;  %v1153_v48 = vpack.c.bf16 %v279_v47, %v272_v27  ;;  %v1157_v31 = vpack.c.bf16 %v1505_v39, %v1503_v38  ;;  %v1165_v38 = vpack.c.bf16 %v1559_v59, %v1549_v55 }
  0x55   :  { %1138 = vmatprep.subr.bf16.mxu1 %v1137_v2  ;;  %1234 = vmatprep.subr.bf16.mxu0 %v1233_v36  ;;  %v1169_v39 = vpack.c.bf16 %v1580_v1, %v1575_v0 }
  0x58   :  { %1140 = vmatpush3.bf16.msra.mxu1 %v1137_v2  ;;  %1236 = vmatpush3.bf16.msra.mxu0 %v1233_v36 }
  0x59   :  { %1142 = vmatprep.subr.bf16.mxu1 %v1141_v15  ;;  %1238 = vmatprep.subr.bf16.mxu0 %v1237_v9 }
  0x5c   :  { %1144 = vmatpush3.bf16.msra.mxu1 %v1141_v15  ;;  %1240 = vmatpush3.bf16.msra.mxu0 %v1237_v9 }
  0x5d   :  { %1146 = vmatprep.subr.bf16.mxu1 %v1145_v44  ;;  %1242 = vmatprep.subr.bf16.mxu0 %v1241_v51 }
  0x60   :  { %1148 = vmatpush3.bf16.msra.mxu1 %v1145_v44  ;;  %1244 = vmatpush3.bf16.msra.mxu0 %v1241_v51 }
  0x61   :  { %1150 = vmatprep.subr.bf16.mxu1 %v1149_v32  ;;  %1246 = vmatprep.subr.bf16.mxu0 %v1245_v33 }
  0x64   :  { %1152 = vmatpush3.bf16.msra.mxu1 %v1149_v32  ;;  %1248 = vmatpush3.bf16.msra.mxu0 %v1245_v33 }
  0x65   :  { %1154 = vmatprep.subr.bf16.mxu1 %v1153_v48  ;;  %1250 = vmatprep.subr.bf16.mxu0 %v1249_v28 }
  0x68   :  { %1156 = vmatpush3.bf16.msra.mxu1 %v1153_v48  ;;  %1252 = vmatpush3.bf16.msra.mxu0 %v1249_v28 }
  0x69   :  { %1158 = vmatprep.subr.bf16.mxu1 %v1157_v31  ;;  %1254 = vmatprep.subr.bf16.mxu0 %v1436_v10 }
  0x6b   :  { %951 = vmatmul.mubr.f32.vlgmr.msra.gmra.mrb[0].mxu1 %v1507_v40  ;;  %1056 = vmatmul.mubr.f32.vlgmr.msra.gmra.mrb[0].mxu0 %v1507_v40 }
  0x6c   :  { %1160 = vmatpush3.bf16.msra.mxu1 %v1157_v31  ;;  %1256 = vmatpush3.bf16.msra.mxu0 %v1436_v10  ;;  %v1173_v10 = vpack.c.bf16 %v1603_v20, %v1590_v8 }
  0x6d   :  { %1162 = vmatprep.subr.bf16.mxu1 %v1161_v54  ;;  %1258 = vmatprep.subr.bf16.mxu0 %v1440_v13 }
  0x6e   :  { %985 = vmatprep.mubr.f32.mxu1 %v1467_v23  ;;  %1090 = vmatprep.mubr.f32.mxu0 %v1450_v17  ;;  %v1181_v17 = vpack.c.bf16 %v1633_v63, %v1625_v56  ;;  %v774_v23 = vld [vmem:[%s1715_s2] ss:$0 sm:$0xff] }
  0x70   :  { %1164 = vmatpush3.bf16.msra.mxu1 %v1161_v54  ;;  %1260 = vmatpush3.bf16.msra.mxu0 %v1440_v13  ;;  %v1177_v13 = vpack.c.bf16 %v1618_v22, %v1609_v30 }
  0x71   :  { %1166 = vmatprep.subr.bf16.mxu1 %v1165_v38  ;;  %1262 = vmatprep.subr.bf16.mxu0 %v1458_v18 }
  0x74   :  { %1168 = vmatpush3.bf16.msra.mxu1 %v1165_v38  ;;  %1264 = vmatpush3.bf16.msra.mxu0 %v1458_v18  ;;  %v1185_v18 = vpack.c.bf16 %v1649_v7, %v1644_v42 }
  0x75   :  { %1170 = vmatprep.subr.bf16.mxu1 %v1169_v39  ;;  %1266 = vmatprep.subr.bf16.mxu0 %v1478_v25 }
  0x78   :  { %1172 = vmatpush3.bf16.msra.mxu1 %v1169_v39  ;;  %1268 = vmatpush3.bf16.msra.mxu0 %v1478_v25 }
  0x79   :  { %1174 = vmatprep.subr.bf16.mxu1 %v1173_v10  ;;  %1270 = vmatprep.subr.bf16.mxu0 %v1496_v34 }
  0x7c   :  { %1176 = vmatpush3.bf16.msra.mxu1 %v1173_v10  ;;  %1272 = vmatpush3.bf16.msra.mxu0 %v1496_v34 }
  0x7d   :  { %1178 = vmatprep.subr.bf16.mxu1 %v1177_v13  ;;  %1274 = vmatprep.subr.bf16.mxu0 %v1525_v46 }
  0x80   :  { %1180 = vmatpush3.bf16.msra.mxu1 %v1177_v13  ;;  %1276 = vmatpush3.bf16.msra.mxu0 %v1525_v46 }
  0x81   :  { %1182 = vmatprep.subr.bf16.mxu1 %v1181_v17  ;;  %1278 = vmatprep.subr.bf16.mxu0 %v1543_v53 }
  0x84   :  { %1184 = vmatpush3.bf16.msra.mxu1 %v1181_v17  ;;  %1280 = vmatpush3.bf16.msra.mxu0 %v1543_v53 }
  0x85   :  { %1186 = vmatprep.subr.bf16.mxu1 %v1185_v18  ;;  %1282 = vmatprep.subr.bf16.mxu0 %v1565_v60 }
  0x88   :  { %1188 = vmatpush3.bf16.msra.mxu1 %v1185_v18  ;;  %1284 = vmatpush3.bf16.msra.mxu0 %v1565_v60 }
  0x8b   :  { %986 = vmatmul.mubr.f32.vlgmr.msra.gmra.mrb[0].mxu1 %v1535_v52  ;;  %1091 = vmatmul.mubr.f32.vlgmr.msra.gmra.mrb[0].mxu0 %v1507_v40 }
 0x15e   :  { %v987_v25 = vpop.f32.mrb[0].mxu1  ;;  %v1092_v34 = vpop.f32.mrb[0].mxu0 }
 0x15f   :  { %v1285_v45 = vadd.f32 %v987_v25, %v774_v23  ;;  %v426_v46 = vpop.f32.mrb[1].mxu1  ;;  %v742_v49 = vpop.f32.mrb[1].mxu0 }
 0x160   :  { %v1287_v53 = vadd.f32 %v774_v23, %v426_v46 }
 0x161   :  { %v1286_v55 = vadd.f32 %v1285_v45, %v1092_v34 }
 0x162   :  { %v1288_v59 = vadd.f32 %v1287_v53, %v742_v49 }
 0x163   :  { %v753_v0 = vmax.f32 %v1286_v55, 0.0 }
 0x164   :  { %v752_v60 = vmax.f32 %v1288_v59, 0.0 }
 0x165   :  { %755 = vst [vmem:[#allocation7 + $0x8] sm:$0xff] %v753_v0 }
 0x166   :  { %754 = vst [vmem:[#allocation7] sm:$0xff] %v752_v60 }
 0x167   :  { %1357 = shalt.err (!%p1354_p6)
}
 0x168   :  { %s1358_s15 = scalar_lea.hbm %s1716_s3, 256 }
 0x169   :  { %p1359_p7 = scmp.ne.s32.totalorder %s1716_s3, %s1358_s15  ;;  %p1362_p8 = scmp.lt.u32.totalorder %s1358_s15, %s1716_s3 }
 0x16b   :  { %p1364_p9 = pnand %p1362_p8, %p1359_p7 }
 0x16d   :  { %1367 = shalt.err (!%p1364_p9)
}
 0x16e   :  { %767 = dma.vmem_to_hbm [thread:$0]  %s762_s12, 256, %s1716_s3, [#allocation4], %s1375_s22, %s1375_s22, %s1376_s23  }
 0x16f   :  { %1372 = dma.done.wait [#allocation4], 256  }
 0x170   :  { %1373 = vsyncadd [#allocation4], 4294967040 }
 0x171   :  { %771 = vsyncpa [#allocation3], 1 }
 0x172   :  { %772 = vsyncpa [#allocation6], 1 }
 0x173   :  { %773 = vsyncpa [#allocation4], 1 }

</bundles_post_ra>
